<compile_context>
chip_gen: v5e
topology: v5e:2x2
jax: 0.10.0
libtpu: 0.0.40
codegen_flags: <defaults>
</compile_context>

<pallas_src>
import functools

import jax
import jax.numpy as jnp
from jax.experimental import pallas as pl
from jax.experimental.pallas import tpu as pltpu


# ---------------------------------------------------------------------------
# forward: GCKMLayer.forward() == h_st.t()  (pure layout plumbing, not a kernel)
# ---------------------------------------------------------------------------
def gckm_forward(h_st):
    return h_st.T


# ---------------------------------------------------------------------------
# helpers
# ---------------------------------------------------------------------------
def _vmem_budget_bytes():
    # Generation-aware budget: ~75% of physical VMEM, capped at 100 MiB.
    # v5e/v6e (128 MiB phys) -> 96-100 MiB; v7x (64 MiB phys) -> 48 MiB.
    try:
        cap = int(pltpu.get_tpu_info().vmem_capacity_bytes)
    except Exception:
        cap = 64 * 1024 * 1024  # safe fallback for all generations
    return min((cap * 3) // 4, 100 * 1024 * 1024)


def _pick_tile(n, target):
    """Largest divisor of n that is <= target and a multiple of 128 (or n)."""
    t = min(target, n)
    for cand in range(t, 0, -1):
        if n % cand == 0 and (cand % 128 == 0 or cand == n):
            return cand
    return n


# ---------------------------------------------------------------------------
# Fused stats kernel.
#   acc_a       = A_norm[i_blk, :] @ x                (f32 accumulation over k)
#   p_parts[i]  = h_aug[:, i_blk] @ acc_a             (written on last k step)
# where h_aug = [h ; 1^T ; 0-padding], so p_parts sums to [h@a ; colsum(a); 0].
#
# TODO(synk): cfg.kernel / kernel_factory is unspecified in the reference; a
#             linear kernel (K = a a^T) is assumed -- that is what allows the
#             N x N gram matrix K to never be materialized.
# ---------------------------------------------------------------------------
def _gckm_stats_kernel(h_ref, anorm_ref, x_ref, p_ref, acc_a,
                       *, tk, x_resident, stats_dtype):
    k = pl.program_id(1)
    nk = pl.num_programs(1)

    # init the per-row-block accumulator of a = A_norm @ x
    @pl.when(k == 0)
    def _():
        acc_a[...] = jnp.zeros_like(acc_a)

    if x_resident:
        start = pl.multiple_of(k * tk, tk)
        x_blk = x_ref[pl.ds(start, tk), :]          # slice resident x
    else:
        x_blk = x_ref[...]                          # streamed (tk, D) block

    # dominant MXU work: bf16 operands (default), f32 accumulation
    acc_a[...] += jnp.dot(anorm_ref[...], x_blk,
                          preferred_element_type=jnp.float32)

    # row-block finished: fold into the (S+1)-sized partial statistics output.
    @pl.when(k == nk - 1)
    def _():
        p_ref[...] = jnp.dot(h_ref[...], acc_a[...].astype(stats_dtype),
                             preferred_element_type=jnp.float32)


def gckm_loss(h_st, a_norm, x, gamma, *, block_n=None, block_k=None,
              operand_dtype=jnp.bfloat16, x_resident=None):
    s, n = h_st.shape
    n_rows, d = x.shape
    assert a_norm.shape == (n, n) and n_rows == n

    # lane-dense feature dim (pad to a multiple of 128) -- zero columns are
    # mathematically transparent for both h@a and colsum(a).
    d_pad = max(128, ((d + 127) // 128) * 128)

    # big tiles: 1024 when D is small, else 512 (largest 128-multiple divisor).
    target = 1024 if d_pad <= 512 else 512
    tm = _pick_tile(n, block_n or target)
    tk = _pick_tile(n, block_k or target)
    # TODO(synk): pad N for graph sizes with no nice divisor <= target (we fall
    #             back to full-extent tiles, which may not fit VMEM for huge N).

    s_aug = ((s + 1 + 7) // 8) * 8   # h rows + one "ones" row, sublane-padded
    itemsize = jnp.dtype(operand_dtype).itemsize
    budget = _vmem_budget_bytes()

    def est(resident):
        return (2 * tm * tk * itemsize                       # A (double-buffered)
                + 2 * s_aug * tm * itemsize                   # h (double-buffered)
                + (2 * n * d_pad if resident else 2 * tk * d_pad) * itemsize
                + tm * d_pad * 4                              # acc_a scratch
                + 2 * s_aug * d_pad * 4)                      # output block

    if x_resident is None:
        x_resident = est(True) <= budget
    assert est(x_resident) <= budget, "tile sizes too large for VMEM budget"

    # ---- operand prep (wrapper-side layout plumbing) -----------------------
    h_f32 = h_st.astype(jnp.float32)
    h_aug = jnp.zeros((s_aug, n), jnp.float32)
    h_aug = h_aug.at[:s, :].set(h_f32)
    h_aug = h_aug.at[s, :].set(1.0)                 # ones row -> colsum(a)
    h_aug = h_aug.astype(operand_dtype)

    x_p = jnp.pad(x.astype(jnp.float32), ((0, 0), (0, d_pad - d)))
    x_p = x_p.astype(operand_dtype)
    a_op = a_norm.astype(operand_dtype)

    if x_resident:
        x_spec = pl.BlockSpec((n, d_pad), lambda i, k: (0, 0))      # resident
    else:
        x_spec = pl.BlockSpec((tk, d_pad), lambda i, k: (k, 0))     # streamed

    n_i = n // tm
    kern = functools.partial(_gckm_stats_kernel, tk=tk,
                             x_resident=x_resident, stats_dtype=operand_dtype)

    p_parts = pl.pallas_call(
        kern,
        out_shape=jax.ShapeDtypeStruct((n_i, s_aug, d_pad), jnp.float32),
        grid_spec=pltpu.PrefetchScalarGridSpec(
            num_scalar_prefetch=0,
            grid=(n_i, n // tk),
            in_specs=[
                pl.BlockSpec((s_aug, tm), lambda i, k: (0, i)),   # h[:, i_blk]
                pl.BlockSpec((tm, tk), lambda i, k: (i, k)),      # A[i_blk,k_blk]
                x_spec,
            ],
            out_specs=pl.BlockSpec((pl.Squeezed(), s_aug, d_pad),
                                   lambda i, k: (i, 0, 0)),
            scratch_shapes=[pltpu.VMEM((tm, d_pad), jnp.float32)],
        ),
        compiler_params=pltpu.CompilerParams(
            # per-i partial outputs -> i is safely parallel (megacore / v7x);
            # k is the contraction axis -> arbitrary, and last.
            dimension_semantics=("parallel", "arbitrary"),
            vmem_limit_bytes=budget,
        ),
    )(h_aug, a_op, x_p)

    # ---- tiny O(S*D + S^2*N) finalize in plain JAX (hoisted out of kernel) --
    p_aug = jnp.sum(p_parts, axis=0)                 # combine per-block partials
    p = p_aug[:s, :]                                 # h @ (A @ x)
    sa = p_aug[s:s + 1, :]                           # colsum(A @ x)
    m = jnp.sum(h_f32, axis=1, keepdims=True)        # rowsum(h)
    nf = jnp.float32(n)
    c = p - (m / nf) * sa                            # h @ mc @ (A @ x)
    l1 = (-0.5) * float(gamma) * jnp.sum(c * c) / nf # = -g/2 tr(h mc K mc h^T)/n
    o = h_f32 @ h_f32.T - jnp.eye(s, dtype=jnp.float32)
    ort1 = jnp.sum(o * o) / nf
    return l1, ort1


# ---------------------------------------------------------------------------
# Plain-JAX glue: dense GCN-normalized adjacency (gcn_aggr).  The edge_index
# scatter of torch_geometric's MessagePassing has no clean Pallas analogue at
# these sizes; the aggregation matmul itself happens inside the Pallas kernel.
# ---------------------------------------------------------------------------
def build_gcn_adjacency(edge_index, num_nodes):
    row, col = edge_index[0], edge_index[1]
    loops = jnp.arange(num_nodes, dtype=edge_index.dtype)
    row = jnp.concatenate([row, loops])
    col = jnp.concatenate([col, loops])
    deg = jnp.zeros((num_nodes,), jnp.float32).at[col].add(1.0)
    dis = jnp.where(deg > 0, jax.lax.rsqrt(deg), 0.0)
    norm = dis[row] * dis[col]
    a = jnp.zeros((num_nodes, num_nodes), jnp.float32).at[col, row].add(norm)
    return a


# ---------------------------------------------------------------------------
# Pure-JAX reference in the ORIGINAL (K-materializing, mc-centering) form.
# ---------------------------------------------------------------------------
def reference_loss(h_st, a_norm, x, gamma):
    s, n = h_st.shape
    a = a_norm @ x
    k = a @ a.T
    mc = jnp.eye(n, dtype=jnp.float32) - jnp.ones((n, n), jnp.float32) / n
    l1 = -0.5 * jnp.trace(h_st @ mc @ k @ mc @ h_st.T) * gamma / n
    o = h_st @ h_st.T - jnp.eye(s, dtype=jnp.float32)
    ort1 = jnp.sum(o * o) / n
    return l1, ort1


if __name__ == "__main__":
    key = jax.random.PRNGKey(0)
    n_nodes, d_feat, s_comp, n_edges = 16, 4, 8, 32
    gamma = 1.0

    k1, k2, k3, k4 = jax.random.split(key, 4)
    x = jax.random.normal(k1, (n_nodes, d_feat), jnp.float32)
    # deterministic stand-in for Parameter(torch.randn((s, n)))
    h_st = jax.random.normal(k2, (s_comp, n_nodes), jnp.float32)
    edge_index = jnp.stack(
        [
            jax.random.randint(k3, (n_edges,), 0, n_nodes),
            jax.random.randint(k4, (n_edges,), 0, n_nodes),
        ],
        axis=0,
    ).astype(jnp.int32)

    a_norm = build_gcn_adjacency(edge_index, n_nodes)

    # forward (== h_st.t(), plain layout plumbing)
    h_fwd = gckm_forward(h_st)

    # exact-algebra validation path: f32 operands, streamed-x code path
    l1_f32, ort_f32 = gckm_loss(h_st, a_norm, x, gamma,
                                operand_dtype=jnp.float32, x_resident=False)
    # production path: bf16 MXU operands, resident-x code path (auto)
    l1_bf, ort_bf = gckm_loss(h_st, a_norm, x, gamma)
    jax.block_until_ready((h_fwd, l1_f32, ort_f32, l1_bf, ort_bf))

    l1_ref, ort_ref = reference_loss(h_st, a_norm, x, gamma)

    assert h_fwd.shape == (n_nodes, s_comp)
    assert jnp.allclose(h_fwd, h_st.T)
    assert jnp.allclose(l1_f32, l1_ref, rtol=1e-4, atol=1e-4), (l1_f32, l1_ref)
    assert jnp.allclose(ort_f32, ort_ref, rtol=1e-4, atol=1e-4), (ort_f32, ort_ref)
    # bf16 operands: small rounding of A_norm / x / h in the trace term
    assert jnp.allclose(l1_bf, l1_ref, rtol=5e-2, atol=5e-2), (l1_bf, l1_ref)
    # ort is computed in f32 in the wrapper -> exact
    assert jnp.allclose(ort_bf, ort_ref, rtol=1e-4, atol=1e-4), (ort_bf, ort_ref)

    print("KERNEL_OK")
</pallas_src>

<mosaic_0001>
module attributes {stable_mosaic.version = 11 : i64} {
  func.func @_gckm_stats_kernel(%arg0: i32, %arg1: i32, %arg2: memref<16x16xf32, #tpu.memory_space<vmem>>, %arg3: memref<16x16xf32, #tpu.memory_space<vmem>>, %arg4: memref<16x128xf32, #tpu.memory_space<vmem>>, %arg5: memref<1x16x128xf32, #tpu.memory_space<vmem>>, %arg6: memref<16x128xf32, #tpu.memory_space<vmem>>) attributes {dimension_semantics = [#tpu.dimension_semantics<parallel>, #tpu.dimension_semantics<arbitrary>], iteration_bounds = array<i64: 1, 1>, scalar_prefetch = 0 : i64, scratch_operands = 1 : i64, tpu.core_type = #tpu.core_type<tc>, window_params = [{transform_indices = @transform_0, window_bounds = array<i64: 16, 16>}, {transform_indices = @transform_1, window_bounds = array<i64: 16, 16>}, {transform_indices = @transform_2, window_bounds = array<i64: 16, 128>}, {transform_indices = @transform_3, window_bounds = array<i64: 1, 16, 128>}]} {
    %c0_i32 = arith.constant 0 : i32
    %0 = arith.cmpi eq, %arg1, %c0_i32 : i32
    %1 = arith.extui %0 : i1 to i32
    %c0_i32_0 = arith.constant 0 : i32
    %2 = arith.cmpi ne, %1, %c0_i32_0 : i32
    scf.if %2 {
      %cst_10 = arith.constant 0.000000e+00 : f32
      %12 = vector.broadcast %cst_10 : f32 to vector<16x128xf32>
      %c0_11 = arith.constant 0 : index
      %c0_12 = arith.constant 0 : index
      %13 = vector.load %arg6[%c0_11, %c0_12] : memref<16x128xf32, #tpu.memory_space<vmem>>, vector<16x128xf32>
      tpu.vector_store %arg6[%c0_11, %c0_12], %12 {strides = array<i32>} : memref<16x128xf32, #tpu.memory_space<vmem>>, vector<16x128xf32>,
    } else {
    }
    %c0 = arith.constant 0 : index
    %c0_1 = arith.constant 0 : index
    %3 = vector.load %arg4[%c0, %c0_1] : memref<16x128xf32, #tpu.memory_space<vmem>>, vector<16x128xf32>
    %c0_2 = arith.constant 0 : index
    %c0_3 = arith.constant 0 : index
    %4 = vector.load %arg6[%c0_2, %c0_3] : memref<16x128xf32, #tpu.memory_space<vmem>>, vector<16x128xf32>
    %c0_4 = arith.constant 0 : index
    %c0_5 = arith.constant 0 : index
    %5 = vector.load %arg3[%c0_4, %c0_5] : memref<16x16xf32, #tpu.memory_space<vmem>>, vector<16x16xf32>
    %cst = arith.constant dense<0.000000e+00> : vector<16x128xf32>
    %6 = tpu.matmul %5, %3, %cst {dimension_numbers = #tpu.dot_dimension_numbers<[1], [0], [0], [1], [0, 0, 1, 1], [], []>} : vector<16x16xf32>, vector<16x128xf32>, vector<16x128xf32> -> vector<16x128xf32>
    %7 = arith.addf %4, %6 : vector<16x128xf32>
    %c0_6 = arith.constant 0 : index
    %c0_7 = arith.constant 0 : index
    %8 = vector.load %arg6[%c0_6, %c0_7] : memref<16x128xf32, #tpu.memory_space<vmem>>, vector<16x128xf32>
    tpu.vector_store %arg6[%c0_6, %c0_7], %7 {strides = array<i32>} : memref<16x128xf32, #tpu.memory_space<vmem>>, vector<16x128xf32>,
    %c0_i32_8 = arith.constant 0 : i32
    %9 = arith.cmpi eq, %arg1, %c0_i32_8 : i32
    %10 = arith.extui %9 : i1 to i32
    %c0_i32_9 = arith.constant 0 : i32
    %11 = arith.cmpi ne, %10, %c0_i32_9 : i32
    scf.if %11 {
      %c0_10 = arith.constant 0 : index
      %c0_11 = arith.constant 0 : index
      %12 = vector.load %arg2[%c0_10, %c0_11] : memref<16x16xf32, #tpu.memory_space<vmem>>, vector<16x16xf32>
      %c0_12 = arith.constant 0 : index
      %c0_13 = arith.constant 0 : index
      %13 = vector.load %arg6[%c0_12, %c0_13] : memref<16x128xf32, #tpu.memory_space<vmem>>, vector<16x128xf32>
      %cst_14 = arith.constant dense<0.000000e+00> : vector<16x128xf32>
      %14 = tpu.matmul %12, %13, %cst_14 {dimension_numbers = #tpu.dot_dimension_numbers<[1], [0], [0], [1], [0, 0, 1, 1], [], []>} : vector<16x16xf32>, vector<16x128xf32>, vector<16x128xf32> -> vector<16x128xf32>
      %c0_15 = arith.constant 0 : index
      %c0_16 = arith.constant 0 : index
      %c0_17 = arith.constant 0 : index
      %15 = vector.load %arg5[%c0_15, %c0_16, %c0_17] : memref<1x16x128xf32, #tpu.memory_space<vmem>>, vector<1x16x128xf32>
      %16 = vector.shape_cast %15 : vector<1x16x128xf32> to vector<16x128xf32>
      %17 = vector.shape_cast %14 : vector<16x128xf32> to vector<1x16x128xf32>
      tpu.vector_store %arg5[%c0_15, %c0_16, %c0_17], %17 {strides = array<i32>} : memref<1x16x128xf32, #tpu.memory_space<vmem>>, vector<1x16x128xf32>,
    } else {
    }
    return
  }
  func.func @transform_0(%arg0: i32, %arg1: i32) -> (i32, i32) {
    %c0_i32 = arith.constant 0 : i32
    %c0_i32_0 = arith.constant 0 : i32
    return %c0_i32, %arg0 : i32, i32
  }
  func.func @transform_1(%arg0: i32, %arg1: i32) -> (i32, i32) {
    %c0_i32 = arith.constant 0 : i32
    return %arg0, %arg1 : i32, i32
  }
  func.func @transform_2(%arg0: i32, %arg1: i32) -> (i32, i32) {
    %c0_i32 = arith.constant 0 : i32
    %c0_i32_0 = arith.constant 0 : i32
    return %arg1, %c0_i32 : i32, i32
  }
  func.func @transform_3(%arg0: i32, %arg1: i32) -> (i32, i32, i32) {
    %c0_i32 = arith.constant 0 : i32
    %c0_i32_0 = arith.constant 0 : i32
    %c0_i32_1 = arith.constant 0 : i32
    return %arg0, %c0_i32, %c0_i32_0 : i32, i32, i32
  }
}

</mosaic_0001>

<bundles_post_ra>
// kernel: tpu_custom_call.1
= control target key start
LH: loop header
LB: loop body
LE: loop exit
PB: predicated region body
PF: predicated region fallthrough
CT: control target
= control target key end

     0   :  { %8 = vsyncpa [#allocation4], 0  ;;  %s336_s0 = inlined_call_operand.hbm [shape: f32[16,16], index: 0, kind: input, shape index: {}]   ;;  %s337_s1 = inlined_call_operand.hbm [shape: f32[16,16], index: 1, kind: input, shape index: {}]   ;;  %s338_s2 = inlined_call_operand.hbm [shape: f32[16,128], index: 2, kind: input, shape index: {}]   ;;  %s339_s3 = inlined_call_operand.hbm [shape: f32[1,16,128], index: 3, kind: output, shape index: {}]  }
   0x1   :  { %9 = vsyncpa [#allocation7], 0 }
   0x2   :  { %10 = vsyncpa [#allocation5], 0  ;;  %s28_s14 = sshll.u32 %s337_s1, 4  ;;  %s282_s15 = smov [#allocation6]   ;;  %s29_s14 = int_to_ptr.hbm [resolvable:$true] %s28_s14 }
   0x3   :  { %s30_s16 = sshll.u32 %s282_s15, 4  ;;  %s15_s19 = sshll.u32 %s336_s0, 4  ;;  %s31_s16 = int_to_ptr.vmem [resolvable:$true] %s30_s16  ;;  %s16_s19 = int_to_ptr.hbm [resolvable:$true] %s15_s19 }
   0x4   :  { %s283_s20 = smov 128   ;;  %s284_s21 = smov 8  }
   0x5   :  { %36 = dma.hbm_to_vmem [thread:$0]  %s29_s14, 256, %s31_s16, [#allocation7], %s283_s20, %s283_s20, %s284_s21  }
   0x6   :  { %s285_s22 = smov [#allocation3]   ;;  %s41_s1 = sshll.u32 %s338_s2, 4  ;;  %s42_s1 = int_to_ptr.hbm [resolvable:$true] %s41_s1 }
   0x7   :  { %s17_s23 = sshll.u32 %s285_s22, 4  ;;  %s286_s0 = smov [#allocation8]   ;;  %s18_s23 = int_to_ptr.vmem [resolvable:$true] %s17_s23 }
   0x8   :  { %23 = dma.hbm_to_vmem [thread:$0]  %s16_s19, 256, %s18_s23, [#allocation4], %s283_s20, %s283_s20, %s284_s21  }
   0x9   :  { %s43_s26 = sshll.u32 %s286_s0, 4  ;;  %s44_s26 = int_to_ptr.vmem [resolvable:$true] %s43_s26 }
   0xa   :  { %49 = dma.hbm_to_vmem [thread:$0]  %s42_s1, 256, %s44_s26, [#allocation7], %s283_s20, %s283_s20, %s284_s21  }
   0xb   :  { %276 = dma.done.wait [#allocation4], 256  }
   0xc   :  { %277 = vsyncadd [#allocation4], 4294967040 }
   0xd   :  { %278 = dma.done.wait [#allocation7], 512  }
   0xe   :  { %279 = vsyncadd [#allocation7], 4294966784  ;;  %v69_v0 = vld [vmem:[#allocation8 + $0x8] sm:$0xff]  ;;  %v68_v1 = vld [vmem:[#allocation8] sm:$0xff]  ;;  %vm74_vm0 = vcmask 130048   ;;  %s287_s2 = smov [#allocation9]  }
   0xf   :  { %170 = vmatpush.msra.mxu2 %v69_v0  ;;  %v73_v2 = vld [vmem:[#allocation6 + $0x8] sm:$0xff]  ;;  %95 = vmatpush.msra.mxu0 %v69_v0  ;;  %v72_v3 = vld [vmem:[#allocation6] sm:$0xff]  ;;  %v112_v6 = vld [vmem:[#allocation3 + $0x8] sm:$0xff]  ;;  %s150_s27 = sshll.u32 %s287_s2, 4  ;;  %s152_s30 = sshll.u32 %s339_s3, 4  ;;  %s151_s27 = int_to_ptr.vmem [resolvable:$true] %s150_s27  ;;  %s153_s30 = int_to_ptr.hbm [resolvable:$true] %s152_s30 }
  0x10   :  { %v111_v7 = vld [vmem:[#allocation3] sm:$0xff] }
  0x11   :  { %171 = vmatpush.msra.mxu2 %v68_v1  ;;  %96 = vmatpush.msra.mxu0 %v68_v1 }
  0x12   :  { %167 = vmatmul.msk.f32.vlgmr.msra.gmra.mxu2 %vm74_vm0, %v73_v2  ;;  %166 = vmatmul.msk.f32.vlgmr.msra.gmra.mxu0 %vm74_vm0, %v72_v3 }
  0x8f   :  { %v98_v5 = vpop.f32.mrf.mxu0 }
  0x95   :  { %v101_v4 = vpop.f32.mrf.mxu2 }
  0x96   :  { %135 = vmatpush.msra.mxu1 %v101_v4  ;;  %172 = vmatpush.msra.mxu3 %v101_v4 }
  0x98   :  { %136 = vmatpush.msra.mxu1 %v98_v5  ;;  %173 = vmatpush.msra.mxu3 %v98_v5 }
  0x99   :  { %169 = vmatmul.msk.f32.vlgmr.msra.gmra.mxu3 %vm74_vm0, %v112_v6  ;;  %168 = vmatmul.msk.f32.vlgmr.msra.gmra.mxu1 %vm74_vm0, %v111_v7 }
 0x116   :  { %v138_v8 = vpop.f32.mrf.mxu1 }
 0x117   :  { %144 = vst [vmem:[#allocation9] sm:$0xff] %v138_v8 }
 0x11c   :  { %v141_v9 = vpop.f32.mrf.mxu3 }
 0x11d   :  { %145 = vst [vmem:[#allocation9 + $0x8] sm:$0xff] %v141_v9 }
 0x11e   :  { %158 = dma.vmem_to_hbm [thread:$0]  %s151_s27, 256, %s153_s30, [#allocation5], %s283_s20, %s283_s20, %s284_s21  }
 0x11f   :  { %280 = dma.done.wait [#allocation5], 256  }
 0x120   :  { %281 = vsyncadd [#allocation5], 4294967040 }
 0x121   :  { %163 = vsyncpa [#allocation4], 1 }
 0x122   :  { %164 = vsyncpa [#allocation7], 1 }
 0x123   :  { %165 = vsyncpa [#allocation5], 1 }

</bundles_post_ra>
